<compile_context>
chip_gen: v5e
topology: v5e:2x2
jax: 0.10.0
libtpu: 0.0.40
codegen_flags: <defaults>
</compile_context>

<pallas_src>
import functools

import jax
import jax.numpy as jnp
from jax.experimental import pallas as pl
from jax.experimental.pallas import tpu as pltpu


def _power_iteration_kernel(w_ref, u_ref, sigma_ref, u_out_ref, v_out_ref, *,
                            power_iterations, eps):
    w = w_ref[...].astype(jnp.float32)                      # (H, K)
    u = u_ref[...].astype(jnp.float32)                      # (1, H)
    v = jnp.zeros((1, w.shape[1]), jnp.float32)             # (1, K)
    for _ in range(power_iterations):                       # static unroll
        # v = l2normalize(W^T u)  (row-vector form: u @ W)
        v_t = jnp.dot(u, w, preferred_element_type=jnp.float32)          # (1, K)
        v_nrm = jnp.sqrt(jnp.sum(v_t * v_t, axis=-1, keepdims=True))     # (1, 1)
        v = v_t / (v_nrm + eps)
        # u = l2normalize(W v)    (row-vector form: v @ W^T via trans_b dot)
        u_t = jax.lax.dot_general(v, w, (((1,), (1,)), ((), ())),
                                  preferred_element_type=jnp.float32)    # (1, H)
        u_nrm = jnp.sqrt(jnp.sum(u_t * u_t, axis=-1, keepdims=True))
        u = u_t / (u_nrm + eps)
    wv = jax.lax.dot_general(v, w, (((1,), (1,)), ((), ())),
                             preferred_element_type=jnp.float32)         # (1, H)
    sigma_ref[...] = jnp.sum(u * wv, axis=-1, keepdims=True)             # (1, 1)
    u_out_ref[...] = u
    v_out_ref[...] = v


def _sn_linear_kernel(sigma_ref, x_ref, w_ref, b_ref, o_ref):
    # y = x @ (W / sigma)^T + b, with the 1/sigma scaling fused on the result.
    # sigma lives in SMEM -> scalar load + splat, no VMEM block needed.
    inv_sigma = 1.0 / sigma_ref[0]                          # scalar (f32)
    x = x_ref[...]                                          # (TM, K) native dtype
    w = w_ref[...]                                          # (H, K)  native dtype
    y = jax.lax.dot_general(x, w, (((1,), (1,)), ((), ())),
                            preferred_element_type=jnp.float32)          # (TM, H)
    y = y * inv_sigma + b_ref[...].astype(jnp.float32)
    o_ref[...] = y.astype(o_ref.dtype)


def spectral_norm_linear(x, weight, bias, u, *, power_iterations=1,
                         eps=1e-12, block_rows=512):
    """SpectralNorm(nn.Linear).forward(x).

    x: (B, K); weight: (H, K); bias: (H,); u: (H,) l2-normalized buffer.
    Returns (y, u_new, v_new, sigma) -- u_new/v_new are the updated power
    iteration buffers (PyTorch mutates them in place on the module).
    """
    assert power_iterations >= 1
    B, K = x.shape
    H, K2 = weight.shape
    assert K == K2 and bias.shape == (H,) and u.shape == (H,)

    u2 = u.reshape(1, H).astype(jnp.float32)

    sigma, u_new, v_new = pl.pallas_call(
        functools.partial(_power_iteration_kernel,
                          power_iterations=power_iterations, eps=eps),
        out_shape=(
            jax.ShapeDtypeStruct((1, 1), jnp.float32),
            jax.ShapeDtypeStruct((1, H), jnp.float32),
            jax.ShapeDtypeStruct((1, K), jnp.float32),
        ),
        grid=(1,),
        in_specs=[
            pl.BlockSpec((H, K), lambda i: (0, 0)),
            pl.BlockSpec((1, H), lambda i: (0, 0)),
        ],
        out_specs=(
            pl.BlockSpec((1, 1), lambda i: (0, 0)),
            pl.BlockSpec((1, H), lambda i: (0, 0)),
            pl.BlockSpec((1, K), lambda i: (0, 0)),
        ),
        cost_estimate=pl.CostEstimate(
            flops=2 * (2 * power_iterations + 1) * H * K,
            transcendentals=2 * power_iterations,
            bytes_accessed=(H * K + 3 * H + 2 * K + 1) * 4,
        ),
    )(weight, u2)

    # Batch tile: full B if it fits, else the largest multiple of 8 (f32
    # sublane granularity) <= block_rows.  No host padding / output slicing:
    # pl.cdiv grid, Pallas masks the partial tail block on write.
    if B <= block_rows:
        tm = B
    else:
        tm = max(8, block_rows - (block_rows % 8))
    grid = (pl.cdiv(B, tm),)

    b2 = bias.reshape(1, H)
    sigma_s = sigma.reshape(1)  # (1,) f32 scalar -> SMEM

    y = pl.pallas_call(
        _sn_linear_kernel,
        out_shape=jax.ShapeDtypeStruct((B, H), x.dtype),
        grid=grid,
        in_specs=[
            pl.BlockSpec(memory_space=pltpu.MemorySpace.SMEM),   # sigma scalar
            pl.BlockSpec((tm, K), lambda i: (i, 0)),             # x tile
            pl.BlockSpec((H, K), lambda i: (0, 0)),              # W (resident)
            pl.BlockSpec((1, H), lambda i: (0, 0)),              # bias (resident)
        ],
        out_specs=pl.BlockSpec((tm, H), lambda i: (i, 0)),
        compiler_params=pltpu.CompilerParams(
            dimension_semantics=("parallel",)),
        cost_estimate=pl.CostEstimate(
            flops=2 * B * K * H,
            transcendentals=0,
            bytes_accessed=(B * K + H * K + B * H + H + 1) * 4,
        ),
    )(sigma_s, x, weight, b2)

    return y, u_new.reshape(H), v_new.reshape(K), sigma.reshape(())
    # TODO(synk): SpectralNorm can wrap any nn.Module; only the nn.Linear
    # forward is implemented here. For e.g. Conv2d, reuse the power-iteration
    # kernel on W.reshape(out_ch, -1) and apply the conv with W/sigma.


def _reference(x, weight, bias, u, power_iterations=1, eps=1e-12):
    w = weight.astype(jnp.float32)
    u_ = u.astype(jnp.float32)
    v_ = None
    for _ in range(power_iterations):
        v_ = w.T @ u_
        v_ = v_ / (jnp.linalg.norm(v_) + eps)
        u_ = w @ v_
        u_ = u_ / (jnp.linalg.norm(u_) + eps)
    sigma = u_ @ (w @ v_)
    w_sn = w / sigma
    y = x @ w_sn.T + bias
    return y, u_, v_, sigma


if __name__ == "__main__":
    key = jax.random.PRNGKey(0)
    k1, k2, k3, k4 = jax.random.split(key, 4)

    B, K, H = 32, 128, 128  # batch, in_features, out_features (height of W)
    x = jax.random.normal(k1, (B, K), dtype=jnp.float32)
    weight = jax.random.normal(k2, (H, K), dtype=jnp.float32) * 0.1
    bias = jax.random.normal(k3, (H,), dtype=jnp.float32) * 0.1
    u0 = jax.random.normal(k4, (H,), dtype=jnp.float32)
    u0 = u0 / (jnp.linalg.norm(u0) + 1e-12)  # _make_params l2-normalizes u

    # block_rows=16 -> 2-step grid at this batch size (exercises the tiled,
    # unpadded path and lets megacore parts shard the parallel axis).
    y, u_new, v_new, sigma = spectral_norm_linear(
        x, weight, bias, u0, power_iterations=1, block_rows=16)
    y = jax.block_until_ready(y)

    y_ref, u_ref, v_ref, sigma_ref = _reference(x, weight, bias, u0, 1)

    # Loose-ish tolerance: in-kernel MXU matmul and XLA's default f32 matmul
    # precision can differ (bf16-pass vs full f32 accumulation paths).
    assert y.shape == (B, H)
    assert jnp.allclose(y, y_ref, atol=2e-2, rtol=2e-2), (
        float(jnp.max(jnp.abs(y - y_ref))))
    assert jnp.allclose(sigma, sigma_ref, atol=2e-2, rtol=2e-2)
    assert jnp.allclose(u_new, u_ref, atol=2e-2, rtol=2e-2)
    assert jnp.allclose(v_new, v_ref, atol=2e-2, rtol=2e-2)
    print("KERNEL_OK")
</pallas_src>

<mosaic_0001>
module attributes {stable_mosaic.version = 11 : i64} {
  func.func @_power_iteration_kernel(%arg0: i32, %arg1: memref<128x128xf32, #tpu.memory_space<vmem>>, %arg2: memref<1x128xf32, #tpu.memory_space<vmem>>, %arg3: memref<1x1xf32, #tpu.memory_space<vmem>>, %arg4: memref<1x128xf32, #tpu.memory_space<vmem>>, %arg5: memref<1x128xf32, #tpu.memory_space<vmem>>) attributes {dimension_semantics = [#tpu.dimension_semantics<arbitrary>], iteration_bounds = array<i64: 1>, scalar_prefetch = 0 : i64, scratch_operands = 0 : i64, tpu.core_type = #tpu.core_type<tc>, window_params = [{pipeline_mode = #tpu.pipeline_mode<synchronous>, transform_indices = @transform_0, window_bounds = array<i64: 128, 128>}, {pipeline_mode = #tpu.pipeline_mode<synchronous>, transform_indices = @transform_1, window_bounds = array<i64: 1, 128>}, {pipeline_mode = #tpu.pipeline_mode<synchronous>, transform_indices = @transform_2, window_bounds = array<i64: 1, 1>}, {pipeline_mode = #tpu.pipeline_mode<synchronous>, transform_indices = @transform_3, window_bounds = array<i64: 1, 128>}, {pipeline_mode = #tpu.pipeline_mode<synchronous>, transform_indices = @transform_4, window_bounds = array<i64: 1, 128>}]} {
    %c0 = arith.constant 0 : index
    %c0_0 = arith.constant 0 : index
    %0 = vector.load %arg1[%c0, %c0_0] : memref<128x128xf32, #tpu.memory_space<vmem>>, vector<128x128xf32>
    %c0_1 = arith.constant 0 : index
    %c0_2 = arith.constant 0 : index
    %1 = vector.load %arg2[%c0_1, %c0_2] : memref<1x128xf32, #tpu.memory_space<vmem>>, vector<1x128xf32>
    %cst = arith.constant dense<0.000000e+00> : vector<1x128xf32>
    %2 = tpu.matmul %1, %0, %cst {dimension_numbers = #tpu.dot_dimension_numbers<[1], [0], [0], [1], [0, 0, 1, 1], [], []>} : vector<1x128xf32>, vector<128x128xf32>, vector<1x128xf32> -> vector<1x128xf32>
    %3 = arith.mulf %2, %2 : vector<1x128xf32>
    %cst_3 = arith.constant dense<0.000000e+00> : vector<1xf32>
    %4 = vector.multi_reduction <add>, %3, %cst_3 [1] : vector<1x128xf32> to vector<1xf32>
    %5 = vector.shape_cast %4 : vector<1xf32> to vector<1x1xf32>
    %6 = math.sqrt %5 : vector<1x1xf32>
    %cst_4 = arith.constant 9.99999996E-13 : f32
    %7 = vector.broadcast %cst_4 : f32 to vector<1x1xf32>
    %8 = arith.addf %6, %7 : vector<1x1xf32>
    %9 = vector.broadcast %8 : vector<1x1xf32> to vector<1x128xf32>
    %10 = arith.divf %2, %9 : vector<1x128xf32>
    %cst_5 = arith.constant dense<0.000000e+00> : vector<1x128xf32>
    %11 = tpu.matmul %10, %0, %cst_5 {dimension_numbers = #tpu.dot_dimension_numbers<[1], [1], [0], [0], [0, 0, 1, 0], [], []>} : vector<1x128xf32>, vector<128x128xf32>, vector<1x128xf32> -> vector<1x128xf32>
    %12 = arith.mulf %11, %11 : vector<1x128xf32>
    %cst_6 = arith.constant dense<0.000000e+00> : vector<1xf32>
    %13 = vector.multi_reduction <add>, %12, %cst_6 [1] : vector<1x128xf32> to vector<1xf32>
    %14 = vector.shape_cast %13 : vector<1xf32> to vector<1x1xf32>
    %15 = math.sqrt %14 : vector<1x1xf32>
    %cst_7 = arith.constant 9.99999996E-13 : f32
    %16 = vector.broadcast %cst_7 : f32 to vector<1x1xf32>
    %17 = arith.addf %15, %16 : vector<1x1xf32>
    %18 = vector.broadcast %17 : vector<1x1xf32> to vector<1x128xf32>
    %19 = arith.divf %11, %18 : vector<1x128xf32>
    %cst_8 = arith.constant dense<0.000000e+00> : vector<1x128xf32>
    %20 = tpu.matmul %10, %0, %cst_8 {dimension_numbers = #tpu.dot_dimension_numbers<[1], [1], [0], [0], [0, 0, 1, 0], [], []>} : vector<1x128xf32>, vector<128x128xf32>, vector<1x128xf32> -> vector<1x128xf32>
    %21 = arith.mulf %19, %20 : vector<1x128xf32>
    %cst_9 = arith.constant dense<0.000000e+00> : vector<1xf32>
    %22 = vector.multi_reduction <add>, %21, %cst_9 [1] : vector<1x128xf32> to vector<1xf32>
    %23 = vector.shape_cast %22 : vector<1xf32> to vector<1x1xf32>
    %c0_10 = arith.constant 0 : index
    %c0_11 = arith.constant 0 : index
    %24 = vector.load %arg3[%c0_10, %c0_11] : memref<1x1xf32, #tpu.memory_space<vmem>>, vector<1x1xf32>
    tpu.vector_store %arg3[%c0_10, %c0_11], %23 {strides = array<i32>} : memref<1x1xf32, #tpu.memory_space<vmem>>, vector<1x1xf32>,
    %c0_12 = arith.constant 0 : index
    %c0_13 = arith.constant 0 : index
    %25 = vector.load %arg4[%c0_12, %c0_13] : memref<1x128xf32, #tpu.memory_space<vmem>>, vector<1x128xf32>
    tpu.vector_store %arg4[%c0_12, %c0_13], %19 {strides = array<i32>} : memref<1x128xf32, #tpu.memory_space<vmem>>, vector<1x128xf32>,
    %c0_14 = arith.constant 0 : index
    %c0_15 = arith.constant 0 : index
    %26 = vector.load %arg5[%c0_14, %c0_15] : memref<1x128xf32, #tpu.memory_space<vmem>>, vector<1x128xf32>
    tpu.vector_store %arg5[%c0_14, %c0_15], %10 {strides = array<i32>} : memref<1x128xf32, #tpu.memory_space<vmem>>, vector<1x128xf32>,
    return
  }
  func.func @transform_0(%arg0: i32) -> (i32, i32) {
    %c0_i32 = arith.constant 0 : i32
    %c0_i32_0 = arith.constant 0 : i32
    %c0_i32_1 = arith.constant 0 : i32
    return %c0_i32, %c0_i32_0 : i32, i32
  }
  func.func @transform_1(%arg0: i32) -> (i32, i32) {
    %c0_i32 = arith.constant 0 : i32
    %c0_i32_0 = arith.constant 0 : i32
    %c0_i32_1 = arith.constant 0 : i32
    return %c0_i32, %c0_i32_0 : i32, i32
  }
  func.func @transform_2(%arg0: i32) -> (i32, i32) {
    %c0_i32 = arith.constant 0 : i32
    %c0_i32_0 = arith.constant 0 : i32
    %c0_i32_1 = arith.constant 0 : i32
    return %c0_i32, %c0_i32_0 : i32, i32
  }
  func.func @transform_3(%arg0: i32) -> (i32, i32) {
    %c0_i32 = arith.constant 0 : i32
    %c0_i32_0 = arith.constant 0 : i32
    %c0_i32_1 = arith.constant 0 : i32
    return %c0_i32, %c0_i32_0 : i32, i32
  }
  func.func @transform_4(%arg0: i32) -> (i32, i32) {
    %c0_i32 = arith.constant 0 : i32
    %c0_i32_0 = arith.constant 0 : i32
    %c0_i32_1 = arith.constant 0 : i32
    return %c0_i32, %c0_i32_0 : i32, i32
  }
}

</mosaic_0001>

<bundles_post_ra>
// kernel: tpu_custom_call.1
= control target key start
LH: loop header
LB: loop body
LE: loop exit
PB: predicated region body
PF: predicated region fallthrough
CT: control target
= control target key end

     0   :  { %10 = vsyncpa [#allocation3], 0  ;;  %s418_s0 = inlined_call_operand.hbm [shape: f32[128,128], index: 0, kind: input, shape index: {}]   ;;  %s419_s1 = inlined_call_operand.hbm [shape: f32[1,128], index: 1, kind: input, shape index: {}]   ;;  %s420_s2 = inlined_call_operand.hbm [shape: f32[1,1], index: 2, kind: output, shape index: {0}]   ;;  %s421_s3 = inlined_call_operand.hbm [shape: f32[1,128], index: 3, kind: output, shape index: {1}]   ;;  %s422_s4 = inlined_call_operand.hbm [shape: f32[1,128], index: 4, kind: output, shape index: {2}]  }
   0x1   :  { %11 = vsyncpa [#allocation6], 0 }
   0x2   :  { %12 = vsyncpa [#allocation4], 0 }
   0x3   :  { %13 = vsyncpa [#allocation9], 0  ;;  %s18_s17 = sshll.u32 %s418_s0, 4  ;;  %s368_s18 = smov [#allocation2]   ;;  %s19_s17 = int_to_ptr.hbm [resolvable:$true] %s18_s17 }
   0x4   :  { %s20_s19 = sshll.u32 %s368_s18, 4  ;;  %s32_s22 = sshll.u32 %s419_s1, 4  ;;  %s21_s19 = int_to_ptr.vmem [resolvable:$true] %s20_s19  ;;  %s33_s22 = int_to_ptr.hbm [resolvable:$true] %s32_s22 }
   0x5   :  { %s369_s23 = smov 128   ;;  %s370_s24 = smov 8  }
   0x6   :  { %26 = dma.hbm_to_vmem [thread:$0]  %s19_s17, 2048, %s21_s19, [#allocation3], %s369_s23, %s369_s23, %s370_s24  }
   0x7   :  { %s371_s25 = smov [#allocation5]  }
   0x8   :  { %s34_s26 = sshll.u32 %s371_s25, 4  ;;  %s35_s26 = int_to_ptr.vmem [resolvable:$true] %s34_s26 }
   0x9   :  { %37 = dma.hbm_to_vmem [thread:$0]  %s33_s22, 16, %s35_s26, [#allocation6]  }
   0xa   :  { %360 = dma.done.wait [#allocation3], 2048  }
   0xb   :  { %361 = vsyncadd [#allocation3], 4294965248 }
   0xc   :  { %362 = dma.done.wait [#allocation6], 16  }
   0xd   :  { %363 = vsyncadd [#allocation6], 4294967280  ;;  %v61_v0 = vld [vmem:[#allocation2 + $0x78] sm:$0xff]  ;;  %v60_v1 = vld [vmem:[#allocation2 + $0x70] sm:$0xff]  ;;  %vm84_vm0 = vcmask 1040384   ;;  %s372_s0 = smov [#allocation8]  }
   0xe   :  { %63 = vmatpush.msra.mxu0 %v61_v0  ;;  %116 = vmatpush.xpose.msra.mxu1 %v61_v0  ;;  %v59_v2 = vld [vmem:[#allocation2 + $0x68] sm:$0xff]  ;;  %v58_v3 = vld [vmem:[#allocation2 + $0x60] sm:$0xff]  ;;  %v57_v4 = vld [vmem:[#allocation2 + $0x58] sm:$0xff]  ;;  %s192_s1 = sshll.u32 %s372_s0, 4  ;;  %s194_s29 = sshll.u32 %s421_s3, 4  ;;  %vm172_vm13 = vcmask 0   ;;  %s193_s1 = int_to_ptr.vmem [resolvable:$true] %s192_s1  ;;  %s195_s29 = int_to_ptr.hbm [resolvable:$true] %s194_s29 }
   0xf   :  { %v56_v5 = vld [vmem:[#allocation2 + $0x50] sm:$0xff]  ;;  %v55_v6 = vld [vmem:[#allocation2 + $0x48] sm:$0xff]  ;;  %v54_v7 = vld [vmem:[#allocation2 + $0x40] sm:$0xff]  ;;  %s373_s30 = smov [#allocation10]   ;;  %s205_s8 = sshll.u32 %s422_s4, 4  ;;  %s206_s8 = int_to_ptr.hbm [resolvable:$true] %s205_s8 }
  0x10   :  { %64 = vmatpush.msra.mxu0 %v60_v1  ;;  %v53_v8 = vld [vmem:[#allocation2 + $0x38] sm:$0xff]  ;;  %v52_v9 = vld [vmem:[#allocation2 + $0x30] sm:$0xff]  ;;  %v51_v10 = vld [vmem:[#allocation2 + $0x28] sm:$0xff]  ;;  %s203_s5 = sshll.u32 %s373_s30, 4  ;;  %s374_s3 = smov [#allocation7]   ;;  %s204_s5 = int_to_ptr.vmem [resolvable:$true] %s203_s5 }
  0x11   :  { %v50_v11 = vld [vmem:[#allocation2 + $0x20] sm:$0xff]  ;;  %v49_v12 = vld [vmem:[#allocation2 + $0x18] sm:$0xff]  ;;  %v48_v13 = vld [vmem:[#allocation2 + $0x10] sm:$0xff]  ;;  %s181_s9 = sshll.u32 %s374_s3, 4  ;;  %s183_s12 = sshll.u32 %s420_s2, 4  ;;  %s182_s9 = int_to_ptr.vmem [resolvable:$true] %s181_s9  ;;  %s184_s12 = int_to_ptr.hbm [resolvable:$true] %s183_s12 }
  0x12   :  { %65 = vmatpush.msra.mxu0 %v59_v2  ;;  %117 = vmatpush.xpose.msra.mxu1 %v60_v1  ;;  %v47_v14 = vld [vmem:[#allocation2 + $0x8] sm:$0xff]  ;;  %v46_v15 = vld [vmem:[#allocation2] sm:$0xff] }
  0x13   :  { %v62_v16 = vld [vmem:[#allocation5] sm:$0x1] }
  0x14   :  { %66 = vmatpush.msra.mxu0 %v58_v3 }
  0x16   :  { %67 = vmatpush.msra.mxu0 %v57_v4  ;;  %118 = vmatpush.xpose.msra.mxu1 %v59_v2 }
  0x18   :  { %68 = vmatpush.msra.mxu0 %v56_v5 }
  0x1a   :  { %69 = vmatpush.msra.mxu0 %v55_v6  ;;  %119 = vmatpush.xpose.msra.mxu1 %v58_v3 }
  0x1c   :  { %70 = vmatpush.msra.mxu0 %v54_v7 }
  0x1e   :  { %71 = vmatpush.msra.mxu0 %v53_v8  ;;  %120 = vmatpush.xpose.msra.mxu1 %v57_v4 }
  0x20   :  { %72 = vmatpush.msra.mxu0 %v52_v9 }
  0x22   :  { %73 = vmatpush.msra.mxu0 %v51_v10  ;;  %121 = vmatpush.xpose.msra.mxu1 %v56_v5 }
  0x24   :  { %74 = vmatpush.msra.mxu0 %v50_v11 }
  0x26   :  { %75 = vmatpush.msra.mxu0 %v49_v12  ;;  %122 = vmatpush.xpose.msra.mxu1 %v55_v6 }
  0x28   :  { %76 = vmatpush.msra.mxu0 %v48_v13 }
  0x2a   :  { %77 = vmatpush.msra.mxu0 %v47_v14  ;;  %123 = vmatpush.xpose.msra.mxu1 %v54_v7 }
  0x2c   :  { %78 = vmatpush.msra.mxu0 %v46_v15 }
  0x2d   :  { %79 = vmatmul.f32.vlgmr.msra.gmra.mxu0 %v62_v16 }
  0x2e   :  { %124 = vmatpush.xpose.msra.mxu1 %v53_v8 }
  0x32   :  { %125 = vmatpush.xpose.msra.mxu1 %v52_v9 }
  0x36   :  { %126 = vmatpush.xpose.msra.mxu1 %v51_v10 }
  0x3a   :  { %127 = vmatpush.xpose.msra.mxu1 %v50_v11 }
  0x3e   :  { %128 = vmatpush.xpose.msra.mxu1 %v49_v12 }
  0x42   :  { %129 = vmatpush.xpose.msra.mxu1 %v48_v13 }
  0x46   :  { %130 = vmatpush.xpose.msra.mxu1 %v47_v14 }
  0x4a   :  { %131 = vmatpush.xpose.msra.mxu1 %v46_v15 }
  0xaa   :  { %v80_v17 = vpop.f32.mrf.mxu0 }
  0xab   :  { %v83_v18 = vmul.f32 %v80_v17, %v80_v17 }
  0xad   :  { %v85_v19 = vsel %vm84_vm0, %v83_v18, 0.0 }
  0xae   :  { %86 = vadd.xlane.f32.xlu0 %v85_v19 }
 0x121   :  { %v87_v20 = vpop.xlane.xlu0 %86 }
 0x122   :  { %232 = vrsqrt.f32 %v87_v20  ;;  %vm95_vm1 = vcmp.eq.f32.partialorder %v87_v20, inf  ;;  %v98_v28 = vand.u32 2147483648, %v87_v20  ;;  %vm97_vm2 = vcmp.eq.f32.partialorder %v87_v20, 0.0 }
 0x128   :  { %v233_v21 = vpop.eup %232 }
 0x129   :  { %v89_v22 = vmul.f32 %v233_v21, %v87_v20 }
 0x12b   :  { %v90_v23 = vmul.f32 %v233_v21, %v89_v22 }
 0x12d   :  { %v91_v24 = vmul.f32 0.5, %v90_v23 }
 0x12f   :  { %v92_v25 = vsub.f32 1.5, %v91_v24 }
 0x131   :  { %v93_v26 = vmul.f32 %v233_v21, %v92_v25 }
 0x133   :  { %v94_v27 = vmul.f32 %v93_v26, %v87_v20 }
 0x135   :  { %v96_v29 = vsel %vm95_vm1, %v87_v20, %v94_v27 }
 0x136   :  { %v99_v30 = vsel %vm97_vm2, %v98_v28, %v96_v29 }
 0x137   :  { %v100_v31 = vadd.f32 1e-12, %v99_v30 }
 0x139   :  { %234 = vrcp.f32 %v100_v31  ;;  %v112_v35 = vand.u32 2147483648, %v100_v31  ;;  %v110_v37 = vand.u32 2147483647, %v100_v31  ;;  %vm106_vm4 = vweird.f32 %v100_v31 }
 0x13b   :  { %v113_v39 = vor.u32 1.1754944e-38, %v112_v35  ;;  %vm111_vm6 = vcmp.eq.f32.partialorder %v110_v37, 8.507059e+37 }
 0x13f   :  { %v235_v32 = vpop.eup %234 }
 0x140   :  { %v102_v33 = vmul.f32 %v235_v32, %v100_v31  ;;  %vm107_vm3 = vweird.f32 %v235_v32 }
 0x141   :  { %vm108_vm5 = vmor %vm106_vm4, %vm107_vm3 }
 0x142   :  { %v103_v34 = vsub.f32 1.0, %v102_v33 }
 0x144   :  { %v104_v36 = vmul.f32 %v235_v32, %v103_v34 }
 0x146   :  { %v105_v38 = vadd.f32 %v235_v32, %v104_v36 }
 0x148   :  { %v109_v40 = vsel %vm108_vm5, %v235_v32, %v105_v38 }
 0x149   :  { %v114_v41 = vsel %vm111_vm6, %v113_v39, %v109_v40 }
 0x14a   :  { %v115_v42 = vmul.f32 %v114_v41, %v80_v17 }
 0x14c   :  { %132 = vmatmul.f32.vlgmr.msra.gmra.mxu1 %v115_v42  ;;  %175 = vst [vmem:[#allocation10] sm:$0x1] %v115_v42 }
 0x1c9   :  { %v133_v43 = vpop.f32.mrf.mxu1 }
 0x1ca   :  { %v136_v44 = vmul.f32 %v133_v43, %v133_v43 }
 0x1cc   :  { %v137_v45 = vsel %vm84_vm0, %v136_v44, 0.0 }
 0x1cd   :  { %138 = vadd.xlane.f32.xlu0 %v137_v45 }
 0x240   :  { %v139_v46 = vpop.xlane.xlu0 %138 }
 0x241   :  { %236 = vrsqrt.f32 %v139_v46  ;;  %vm147_vm7 = vcmp.eq.f32.partialorder %v139_v46, inf  ;;  %v150_v54 = vand.u32 2147483648, %v139_v46  ;;  %vm149_vm8 = vcmp.eq.f32.partialorder %v139_v46, 0.0 }
 0x247   :  { %v237_v47 = vpop.eup %236 }
 0x248   :  { %v141_v48 = vmul.f32 %v237_v47, %v139_v46 }
 0x24a   :  { %v142_v49 = vmul.f32 %v237_v47, %v141_v48 }
 0x24c   :  { %v143_v50 = vmul.f32 0.5, %v142_v49 }
 0x24e   :  { %v144_v51 = vsub.f32 1.5, %v143_v50 }
 0x250   :  { %v145_v52 = vmul.f32 %v237_v47, %v144_v51 }
 0x252   :  { %v146_v53 = vmul.f32 %v145_v52, %v139_v46 }
 0x254   :  { %v148_v55 = vsel %vm147_vm7, %v139_v46, %v146_v53 }
 0x255   :  { %v151_v56 = vsel %vm149_vm8, %v150_v54, %v148_v55 }
 0x256   :  { %v152_v57 = vadd.f32 1e-12, %v151_v56 }
 0x258   :  { %238 = vrcp.f32 %v152_v57  ;;  %v164_v61 = vand.u32 2147483648, %v152_v57  ;;  %v162_v63 = vand.u32 2147483647, %v152_v57  ;;  %vm158_vm10 = vweird.f32 %v152_v57 }
 0x25a   :  { %v165_v1 = vor.u32 1.1754944e-38, %v164_v61  ;;  %vm163_vm12 = vcmp.eq.f32.partialorder %v162_v63, 8.507059e+37 }
 0x25e   :  { %v239_v58 = vpop.eup %238 }
 0x25f   :  { %v154_v59 = vmul.f32 %v239_v58, %v152_v57  ;;  %vm159_vm9 = vweird.f32 %v239_v58 }
 0x260   :  { %vm160_vm11 = vmor %vm158_vm10, %vm159_vm9 }
 0x261   :  { %v155_v60 = vsub.f32 1.0, %v154_v59 }
 0x263   :  { %v156_v62 = vmul.f32 %v239_v58, %v155_v60 }
 0x265   :  { %v157_v0 = vadd.f32 %v239_v58, %v156_v62 }
 0x267   :  { %v161_v2 = vsel %vm160_vm11, %v239_v58, %v157_v0 }
 0x268   :  { %v166_v3 = vsel %vm163_vm12, %v165_v1, %v161_v2 }
 0x269   :  { %v167_v4 = vmul.f32 %v166_v3, %v133_v43 }
 0x26b   :  { %v168_v5 = vmul.f32 %v167_v4, %v133_v43  ;;  %174 = vst [vmem:[#allocation8] sm:$0x1] %v167_v4 }
 0x26c   :  { %197 = dma.vmem_to_hbm [thread:$0]  %s193_s1, 16, %s195_s29, [#allocation9]  }
 0x26d   :  { %v169_v6 = vsel %vm84_vm0, %v168_v5, 0.0  ;;  %208 = dma.vmem_to_hbm [thread:$0]  %s204_s5, 16, %s206_s8, [#allocation9]  }
 0x26e   :  { %170 = vadd.xlane.f32.xlu1 %v169_v6 }
 0x2e1   :  { %v171_v7 = vpop.xlane.xlu1 %170 }
 0x2e2   :  { %173 = vst.msk [vmem:[#allocation7] sm:$0x1] %vm172_vm13, %v171_v7 }
 0x2e3   :  { %186 = dma.vmem_to_hbm [thread:$0]  %s182_s9, 16, %s184_s12, [#allocation4]  }
 0x2e4   :  { %364 = dma.done.wait [#allocation4], 16  }
 0x2e5   :  { %365 = vsyncadd [#allocation4], 4294967280 }
 0x2e6   :  { %366 = dma.done.wait [#allocation9], 32  }
 0x2e7   :  { %367 = vsyncadd [#allocation9], 4294967264 }
 0x2e8   :  { %221 = vsyncpa [#allocation3], 1 }
 0x2e9   :  { %222 = vsyncpa [#allocation6], 1 }
 0x2ea   :  { %223 = vsyncpa [#allocation4], 1 }
 0x2eb   :  { %224 = vsyncpa [#allocation9], 1 }

</bundles_post_ra>
